<compile_context>
chip_gen: v5e
topology: v5e:2x2
jax: 0.10.0
libtpu: 0.0.40
codegen_flags: <defaults>
</compile_context>

<pallas_src>
import functools

import jax
import jax.numpy as jnp
from jax.experimental import pallas as pl
from jax.experimental.pallas import tpu as pltpu


def _consensus_avg_kernel(x_ref, o_ref, *, inv_t):
    # x_ref: (Bt, T, Ct) native-dtype tile; o_ref: (Bt, 1, Ct).
    # Cross-sublane (XLU) reduce over the segment axis with fp32 accumulation,
    # then scale by the static constant 1/T.  keepdims=True keeps the natural
    # one-sublane-per-row layout so no relayout is needed before the store.
    s = jnp.sum(x_ref[...], axis=1, keepdims=True, dtype=jnp.float32)
    o_ref[...] = (s * inv_t).astype(o_ref.dtype)


def _round_up(n, m):
    return ((n + m - 1) // m) * m


def segment_consensus(x, consensus_type="avg", dim=1):
    """JAX/Pallas equivalent of SegmentConsensus.forward on (B, T, C) input."""
    if consensus_type == "identity":
        return x
    if consensus_type != "avg":
        # PyTorch module returns None for unknown consensus types.
        return None
    assert dim == 1, "kernel implements consensus over dim=1 (segment axis)"
    assert x.ndim == 3, "expected (B, T, C) input"

    B, T, C = x.shape
    itemsize = jnp.dtype(x.dtype).itemsize
    # Sublane packing multiple: 8 for 4-byte dtypes, 16 for 2-byte, 32 for 1-byte.
    sub = 8 * max(1, 4 // itemsize)
    cp = _round_up(C, 128)      # lane footprint of a full-C block
    t_pad = _round_up(T, sub)   # sublane footprint of the segment axis

    # ---- block sizing (from the in-VMEM footprint, not raw HBM bytes) -------
    target_bytes = 4 * 1024 * 1024  # ~4 MiB blocks: near-roofline regime, and
                                    # 2x-buffered fits v5e/v6e/v7x VMEM budgets.
    if t_pad * cp * itemsize <= target_bytes:
        Ct = C                       # full class extent per block
    else:
        # Very large C: chunk the class axis in multiples of 128 lanes.
        lanes = max(1, target_bytes // (t_pad * 128 * itemsize))
        Ct = min(lanes * 128, C)
    ct_pad = _round_up(Ct, 128)
    n_c = pl.cdiv(C, Ct)

    row_vmem = t_pad * ct_pad * itemsize        # one batch row of one block
    bt = max(1, target_bytes // row_vmem)
    if n_c == 1 and B >= 2:
        # v7x megacore: keep >= 2 parallel grid steps so both TensorCores get
        # work (costs only one extra ~0.35 us step on single-TC v5e/v6e).
        bt = min(bt, pl.cdiv(B, 2))
    Bt = int(max(1, min(bt, B)))
    n_b = pl.cdiv(B, Bt)

    # ---- VMEM budget: double-buffered in/out blocks + f32 accumulation temp -
    in_block = Bt * t_pad * ct_pad * itemsize
    out_block = Bt * sub * ct_pad * itemsize     # keepdim axis pads to `sub`
    f32_temp = 0 if x.dtype == jnp.float32 else Bt * _round_up(T, 8) * ct_pad * 4
    vmem_needed = 2 * in_block + 2 * out_block + f32_temp + (2 << 20)
    vmem_limit = int(min(48 << 20, max(vmem_needed, 24 << 20)))  # v7x-safe cap

    kernel = functools.partial(_consensus_avg_kernel, inv_t=1.0 / T)

    # NOTE: with grid = cdiv(...), edge blocks along B / C may read
    # out-of-range data; this is safe because each output element depends only
    # on its own (T,) slab and out-of-range output regions are never kept.
    return pl.pallas_call(
        kernel,
        out_shape=jax.ShapeDtypeStruct((B, 1, C), x.dtype),
        grid=(n_b, n_c),
        in_specs=[pl.BlockSpec((Bt, T, Ct), lambda b, c: (b, 0, c))],
        out_specs=pl.BlockSpec((Bt, 1, Ct), lambda b, c: (b, 0, c)),
        compiler_params=pltpu.CompilerParams(
            dimension_semantics=("parallel", "parallel"),
            vmem_limit_bytes=vmem_limit,
        ),
    )(x)


if __name__ == "__main__":
    key = jax.random.PRNGKey(0)
    # batch=2, num_segments=8, num_classes=32
    x = jax.random.normal(key, (2, 8, 32), dtype=jnp.float32)

    # 'avg' consensus via the Pallas kernel (f32)
    out_avg = jax.block_until_ready(segment_consensus(x, "avg", dim=1))
    ref = jnp.mean(x, axis=1, keepdims=True)
    assert out_avg.shape == (2, 1, 32)
    assert jnp.allclose(out_avg, ref, atol=1e-5, rtol=1e-5)

    # bf16 path (native-dtype reads/writes, fp32 accumulation inside kernel)
    xb = x.astype(jnp.bfloat16)
    out_bf16 = jax.block_until_ready(segment_consensus(xb, "avg", dim=1))
    ref_bf16 = jnp.mean(xb.astype(jnp.float32), axis=1, keepdims=True).astype(jnp.bfloat16)
    assert out_bf16.shape == (2, 1, 32)
    assert jnp.allclose(out_bf16.astype(jnp.float32),
                        ref_bf16.astype(jnp.float32), atol=2e-2, rtol=2e-2)

    # batch not divisible by the block (exercises the masked/partial edge block)
    x5 = jax.random.normal(jax.random.PRNGKey(1), (5, 8, 32), dtype=jnp.float32)
    out5 = jax.block_until_ready(segment_consensus(x5, "avg", dim=1))
    ref5 = jnp.mean(x5, axis=1, keepdims=True)
    assert out5.shape == (5, 1, 32)
    assert jnp.allclose(out5, ref5, atol=1e-5, rtol=1e-5)

    # 'identity' consensus (pure passthrough, no kernel)
    out_id = jax.block_until_ready(segment_consensus(x, "identity", dim=1))
    assert out_id.shape == x.shape
    assert jnp.allclose(out_id, x)

    print("KERNEL_OK")
</pallas_src>

<mosaic_0001>
module attributes {stable_mosaic.version = 11 : i64} {
  func.func @_consensus_avg_kernel(%arg0: i32, %arg1: i32, %arg2: memref<1x8x32xf32, #tpu.memory_space<vmem>>, %arg3: memref<1x1x32xf32, #tpu.memory_space<vmem>>) attributes {dimension_semantics = [#tpu.dimension_semantics<parallel>, #tpu.dimension_semantics<parallel>], iteration_bounds = array<i64: 2, 1>, scalar_prefetch = 0 : i64, scratch_operands = 0 : i64, tpu.core_type = #tpu.core_type<tc>, window_params = [{transform_indices = @transform_0, window_bounds = array<i64: 1, 8, 32>}, {transform_indices = @transform_1, window_bounds = array<i64: 1, 1, 32>}]} {
    %c0 = arith.constant 0 : index
    %c0_0 = arith.constant 0 : index
    %c0_1 = arith.constant 0 : index
    %0 = vector.load %arg2[%c0, %c0_0, %c0_1] : memref<1x8x32xf32, #tpu.memory_space<vmem>>, vector<1x8x32xf32>
    %cst = arith.constant dense<0.000000e+00> : vector<1x32xf32>
    %1 = vector.multi_reduction <add>, %0, %cst [1] : vector<1x8x32xf32> to vector<1x32xf32>
    %2 = vector.shape_cast %1 : vector<1x32xf32> to vector<1x1x32xf32>
    %cst_2 = arith.constant 1.250000e-01 : f32
    %3 = vector.broadcast %cst_2 : f32 to vector<1x1x32xf32>
    %4 = arith.mulf %2, %3 : vector<1x1x32xf32>
    %c0_3 = arith.constant 0 : index
    %c0_4 = arith.constant 0 : index
    %c0_5 = arith.constant 0 : index
    %5 = vector.load %arg3[%c0_3, %c0_4, %c0_5] : memref<1x1x32xf32, #tpu.memory_space<vmem>>, vector<1x1x32xf32>
    tpu.vector_store %arg3[%c0_3, %c0_4, %c0_5], %4 {strides = array<i32>} : memref<1x1x32xf32, #tpu.memory_space<vmem>>, vector<1x1x32xf32>,
    return
  }
  func.func @transform_0(%arg0: i32, %arg1: i32) -> (i32, i32, i32) {
    %c0_i32 = arith.constant 0 : i32
    %c0_i32_0 = arith.constant 0 : i32
    return %arg0, %c0_i32, %arg1 : i32, i32, i32
  }
  func.func @transform_1(%arg0: i32, %arg1: i32) -> (i32, i32, i32) {
    %c0_i32 = arith.constant 0 : i32
    %c0_i32_0 = arith.constant 0 : i32
    return %arg0, %c0_i32, %arg1 : i32, i32, i32
  }
}

</mosaic_0001>

<bundles_post_ra>
// kernel: tpu_custom_call.1
= control target key start
LH: loop header
LB: loop body
LE: loop exit
PB: predicated region body
PF: predicated region fallthrough
CT: control target
= control target key end

     0   :  { %6 = vsyncpa [#allocation3], 0  ;;  %s569_s0 = inlined_call_operand.hbm [shape: f32[2,8,32], index: 0, kind: input, shape index: {}]   ;;  %s570_s1 = inlined_call_operand.hbm [shape: f32[2,1,32], index: 1, kind: output, shape index: {}]  }
   0x1   :  { %8 = vsyncpa [#allocation3 + $0x1], 0 }
   0x2   :  { %9 = vsyncpa [#allocation4], 0 }
   0x3   :  { %11 = vsyncpa [#allocation4 + $0x1], 0  ;;  %s448_s6 = smov 0   ;;  %s450_s7 = smov 0  }
   0x4   :  { %s452_s8 = smov 0   ;;  %s454_s9 = smov 0  }
   0x5   :  { %s456_s10 = smov 0   ;;  %s458_s11 = smov 0  }
   0x6 LB: > { %s252_s12 = sadd.s32 4294967295, %s436_s11   ;;  %s253_s13 = sadd.s32 4294967294, %s436_s11   ;;  %s436_s11 = sphi %s458_s11, %s17_s11   ;;  %s432_s10 = sphi %s456_s10, %s579_s10   ;;  %s428_s9 = sphi %s454_s9, %s578_s9   ;;  %s424_s8 = sphi %s452_s8, %s577_s8   ;;  %s420_s7 = sphi %s450_s7, %s576_s7   ;;  %s416_s6 = sphi %s448_s6, %s575_s6  }
   0x7   : > { %s29_s14 = sadd.s32 1, %s432_s10  ;;  %s38_s15 = sadd.s32 1, %s424_s8 }
   0x8   : > { %p31_p0 = scmp.ge.s32.totalorder %s29_s14, 2  ;;  %p45_p1 = scmp.ne.s32.totalorder %s424_s8, %s420_s7 }
   0x9   : > { %p46_p2 = scmp.eq.s32.totalorder %s436_s11, 0  ;;  %p51_p3 = scmp.ne.s32.totalorder %s420_s7, %s416_s6 }
   0xa   : > { %s581_s14 = smov (%p31_p0, %s29_s14), 0  ;;  %p52_p5 = scmp.eq.s32.totalorder %s252_s12, 0 }
   0xb   : > { %p489_p4 = por %p46_p2, %p45_p1  ;;  %s33_s17 = ssub.s32 %s432_s10, %s581_s14 }
   0xc   : > { %p77_p6 = scmp.eq.s32.totalorder %s252_s12, 1  ;;  %p36_p7 = scmp.eq.s32.totalorder %s33_s17, 0 }
   0xd   : > { %p495_p8 = por %p52_p5, %p51_p3  ;;  %p83_p10 = scmp.eq.s32.totalorder %s253_s13, 1 }
   0xe   : > { %p499_p9 = por %p77_p6, %p45_p1  ;;  %p255_p12 = scmp.ge.s32.totalorder %s436_s11, 2 }
   0xf   : > { %s504_s20 = scalar_select %p36_p7, %s424_s8, %s38_s15  }
  0x10   : > { %p506_p11 = por %p83_p10, %p51_p3  ;;  %p274_p13 = scmp.lt.s32.totalorder %s436_s11, 2 }
  0x11   : > { %s103_s22 = sand.u32 1, %s424_s8   ;;  %s257_s24 = sshll.u32 %s432_s10, 3 }
  0x12   : > { %s256_s23 = sshll.u32 %s103_s22, 3  ;;  %s112_s27 = scalar_lea.hbm %s569_s0, %s257_s24 }
  0x13   : > { %s107_s28 = scalar_lea.vmem [#allocation2], %s256_s23  ;;  %s114_s30 = sshll.u32 %s112_s27, 4  ;;  %s115_s30 = int_to_ptr.hbm [resolvable:$true] %s114_s30 }
  0x14   : > { %s116_s29 = sshll.u32 %s107_s28, 4  ;;  %p267_p0 = pnand %p274_p13, %p489_p4  ;;  %s117_s29 = int_to_ptr.vmem [resolvable:$true] %s116_s29 }
  0x15   : > { %p258_p1 = scmp.ge.s32.totalorder %s436_s11, 1  ;;  %p121_p2 = scmp.lt.s32.totalorder %s436_s11, 3 }
  0x16   : > { %s104_s2 = scalar_lea.sflag [#allocation3], %s103_s22 }
  0x17   : > { %269 = dma.hbm_to_vmem [thread:$0]  (!%p267_p0), %s115_s30, 128, %s117_s29, %s104_s2  }
  0x18   : > { %p122_p3 = pnand %p258_p1, %p121_p2 }
  0x19   : > { %s522_s3 = sand.u32 (!%p122_p3), 1, %s420_s7  }
  0x1a   : > { %125 = sbr.rel (%p122_p3) target bundleno = 51 (0x33), region = 24  ;;  %s259_s4 = sshll.u32 (!%p122_p3), %s522_s3, 3 }
  0x1b   : > { %s128_s5 = scalar_lea.sflag (!%p122_p3), [#allocation3], %s522_s3  ;;  %s131_s12 = scalar_lea.vmem (!%p122_p3), [#allocation2], %s259_s4 }
  0x1f   : > { %407 = dma.done.wait (%p495_p8), %s128_s5, 128  }
  0x20   : > { %409 = vsyncadd (%p495_p8), %s128_s5, 4294967168  ;;  %vm151_vm0 = vcmask 261120   ;;  %v150_v0 = vld [vmem:[%s131_s12] sm:$0xff]  ;;  %s172_s16 = scalar_lea.hbm %s570_s1, %s428_s9  ;;  %s149_s17 = scalar_lea.vmem [#allocation5], %s522_s3  ;;  %vm160_vm1 = vcmask 253952  }
  0x21   : > { %v152_v1 = vsel %vm151_vm0, %v150_v0, 0.0  ;;  %s174_s22 = sshll.u32 %s149_s17, 4  ;;  %s176_s18 = sshll.u32 %s172_s16, 4  ;;  %s175_s22 = int_to_ptr.vmem [resolvable:$true] %s174_s22  ;;  %s177_s18 = int_to_ptr.hbm [resolvable:$true] %s176_s18 }
  0x22   : > { %v153_v2 = vrot.slane %v152_v1, 4  ;;  %s163_s23 = scalar_lea.sflag [#allocation4], %s522_s3  ;;  %s368_s24 = sshra.s32 %s177_s18, 4  ;;  %s369_s24 = int_to_ptr.hbm [resolvable:$true] %s368_s24 }
  0x23   : > { %s370_s25 = scalar_lea.hbm %s369_s24, 1  ;;  %s374_s27 = scalar_lea.hbm %s570_s1, 2 }
  0x24   : > { %v154_v3 = vadd.f32 %v153_v2, %v152_v1  ;;  %p371_p4 = scmp.ne.s32.totalorder %s369_s24, %s370_s25  ;;  %p375_p7 = scmp.lt.s32.totalorder %s369_s24, %s570_s1 }
  0x25   : > { %p376_p8 = scmp.lt.s32.totalorder %s374_s27, %s370_s25 }
  0x26   : > { %v155_v4 = vrot.slane %v154_v3, 2  ;;  %p372_p5 = pnand %p371_p4, %p499_p9 }
  0x27   : > { %p377_p10 = por %p376_p8, %p375_p7 }
  0x28   : > { %v156_v5 = vadd.f32 %v155_v4, %v154_v3  ;;  %p373_p6 = pneg %p372_p5 }
  0x2a   : > { %v157_v6 = vrot.slane %v156_v5, 1  ;;  %p378_p13 = pnand %p377_p10, %p373_p6 }
  0x2c   : > { %v158_v7 = vadd.f32 %v157_v6, %v156_v5 }
  0x2e   : > { %v159_v8 = vmul.f32 0.125, %v158_v7 }
  0x30   : > { %161 = vst.msk [vmem:[%s149_s17] sm:$0x1] %vm160_vm1, %v159_v8 }
  0x31   : > { %381 = shalt.err (!%p378_p13)
}
  0x32   : > { %264 = dma.vmem_to_hbm [thread:$0]  (%p499_p9), %s175_s22, 16, %s177_s18, %s163_s23  }
  0x33 PF: > { %s188_s30 = sand.u32 1, %s416_s6   ;;  %p271_p0 = pnand %p255_p12, %p506_p11 }
  0x34   : > { %s189_s2 = scalar_lea.sflag [#allocation4], %s188_s30 }
  0x35   : > { %p272_p1 = pneg %p271_p0 }
  0x37   : > { %411 = dma.done.wait (%p272_p1), %s189_s2, 16  }
  0x38   : > { %413 = vsyncadd (%p272_p1), %s189_s2, 4294967280  ;;  %s17_s11 = sadd.s32 1, %s436_s11   ;;  %s575_s6 = smov %s420_s7 }
  0x39   : > { %p14_p2 = scmp.ge.s32.totalorder %s17_s11, 4   ;;  %s576_s7 = smov %s424_s8 }
  0x3a   : > { %s577_s8 = smov %s504_s20  ;;  %s578_s9 = smov %s432_s10 }
  0x3b   : > { %s579_s10 = smov %s581_s14  ;;  %16 = sbr.rel (!%p14_p2) target bundleno = 6 (0x6), region = 69 }
  0x40   :  { %194 = vsyncpa [#allocation3], 1 }
  0x41   :  { %196 = vsyncpa [#allocation3 + $0x1], 1 }
  0x42   :  { %197 = vsyncpa [#allocation4], 1 }
  0x43   :  { %199 = vsyncpa [#allocation4 + $0x1], 1 }

</bundles_post_ra>
